<compile_context>
chip_gen: v5e
topology: v5e:2x2
jax: 0.10.0
libtpu: 0.0.40
codegen_flags: <defaults>
</compile_context>

<pallas_src>
import jax
import jax.numpy as jnp
from jax import lax
from jax.experimental import pallas as pl
from jax.experimental.pallas import tpu as pltpu

INPUT_DIM = 1
HIDDEN_DIM = 64
OUTPUT_DIM = 10   # pred_len

_OUT_PAD = 128    # fc output padded to one full lane block
_SUBLANE = 8
_TILE_B = 8       # batch rows per grid step (one sublane group)


def _lstm_fc_kernel(xw_ref,     # (T, TILE_B, 4H) f32 : x*w_ih + b_ih + b_hh, gate order (i,f,o,g)
                    w_hh_ref,   # (H, 4H)          bf16, gate order (i,f,o,g)
                    w_fc_ref,   # (H, Op)          f32, fc.weight.T padded to Op lanes
                    b_fc_ref,   # (1, Op)          f32
                    out_ref):   # (TILE_B, Op)     f32
    T = xw_ref.shape[0]
    Bt = xw_ref.shape[1]
    H = w_hh_ref.shape[0]

    # Loop-invariant recurrent weights: unpadded bf16 (64, 256) = 32 KiB (8 vregs),
    # cheap to keep live across the unrolled steps.
    w_hh = w_hh_ref[...]

    h0 = jnp.zeros((Bt, H), jnp.float32)
    c0 = jnp.zeros((Bt, H), jnp.float32)

    def step(t, carry):
        h, c = carry
        # Recurrent matmul in bf16 (single-pass MXU), accumulate in f32.
        gates = xw_ref[t] + jnp.dot(h.astype(jnp.bfloat16), w_hh,
                                    preferred_element_type=jnp.float32)
        # Gate order (i, f, o, g): one EUP tanh over the contiguous 3H sigmoid slab
        # (sigmoid(x) = 0.5*tanh(0.5*x) + 0.5) and one tanh over the last H lanes.
        sig = 0.5 * jnp.tanh(0.5 * gates[:, :3 * H]) + 0.5
        i_g = sig[:, 0 * H:1 * H]
        f_g = sig[:, 1 * H:2 * H]
        o_g = sig[:, 2 * H:3 * H]
        g_g = jnp.tanh(gates[:, 3 * H:])
        # Elementwise combine stays in f32 (v5e has no bf16 VPU/EUP; keeps c accurate).
        c_new = f_g * c + i_g * g_g
        h_new = o_g * jnp.tanh(c_new)
        return (h_new, c_new)

    # Strictly serial recurrence; cap the unroll so vreg pressure stays bounded for larger T.
    h_last, _ = lax.fori_loop(0, T, step, (h0, c0), unroll=min(T, 8))

    # fc on the last time step's hidden state (single small matmul, off the hot path -> f32).
    out_ref[...] = (
        jnp.dot(h_last, w_fc_ref[...], preferred_element_type=jnp.float32)
        + b_fc_ref[...]
    )


def _reorder_gates(w, H):
    """(..., 4H) in PyTorch gate order (i, f, g, o) -> (i, f, o, g).  No padding."""
    i_, f_, g_, o_ = (w[..., k * H:(k + 1) * H] for k in range(4))
    return jnp.concatenate([i_, f_, o_, g_], axis=-1)


def seq2seq_forward(x, params):
    """x: (B, T, I) batch-first, like the PyTorch module.  Returns (B, OUTPUT_DIM)."""
    w_ih, w_hh, b_ih, b_hh, w_fc, b_fc = params
    B, T, I = x.shape
    H = w_hh.shape[1]
    O = w_fc.shape[0]
    Op = _OUT_PAD
    Bp = pl.cdiv(B, _TILE_B) * _TILE_B

    # Gate reorder (i, f, g, o) -> (i, f, o, g); native H=64 gate blocks (no padding).
    w_ih_r = _reorder_gates(w_ih.T.astype(jnp.float32), H)                          # (1, 4H)
    b_all = _reorder_gates((b_ih + b_hh).reshape(1, 4 * H).astype(jnp.float32), H)  # (1, 4H)
    w_hh_r = _reorder_gates(w_hh.T.astype(jnp.float32), H).astype(jnp.bfloat16)     # (H, 4H) bf16

    # Input projection done once in the wrapper: input_dim == 1 makes it a rank-1
    # broadcast-multiply.  Produces a lane-dense (T, Bp, 4H) slab (no (T, Bp, 1) layout
    # inflation, no in-kernel scratch).
    x_tm = jnp.transpose(x, (1, 0, 2)).astype(jnp.float32)         # (T, B, 1)
    x_tm = jnp.pad(x_tm, ((0, 0), (0, Bp - B), (0, 0)))            # (T, Bp, 1)
    xw_all = x_tm * w_ih_r[None] + b_all[None]                     # (T, Bp, 4H)

    # fc weights padded to a lane-dense 128-wide output block (sliced back after the call).
    w_fc_t = jnp.pad(w_fc.T.astype(jnp.float32), ((0, 0), (0, Op - O)))             # (H, Op)
    b_fc_r = jnp.pad(b_fc.reshape(1, O).astype(jnp.float32), ((0, 0), (0, Op - O))) # (1, Op)

    grid = (Bp // _TILE_B,)
    out_padded = pl.pallas_call(
        _lstm_fc_kernel,
        out_shape=jax.ShapeDtypeStruct((Bp, Op), jnp.float32),
        grid_spec=pltpu.PrefetchScalarGridSpec(
            num_scalar_prefetch=0,
            grid=grid,
            in_specs=[
                pl.BlockSpec((T, _TILE_B, 4 * H), lambda b: (0, b, 0)),  # xw, batch-tiled
                pl.BlockSpec((H, 4 * H), lambda b: (0, 0)),              # w_hh (bf16), shared
                pl.BlockSpec((H, Op), lambda b: (0, 0)),                 # fc weight, shared
                pl.BlockSpec((1, Op), lambda b: (0, 0)),                 # fc bias, shared
            ],
            out_specs=pl.BlockSpec((_TILE_B, Op), lambda b: (b, 0)),
        ),
        # Parallel batch axis so v7x can shard batch tiles across its 2 TensorCores.
        compiler_params=pltpu.CompilerParams(dimension_semantics=("parallel",)),
    )(xw_all, w_hh_r, w_fc_t, b_fc_r)
    return out_padded[:B, :O]


def init_params(key, input_dim=INPUT_DIM, hidden_dim=HIDDEN_DIM, output_dim=OUTPUT_DIM):
    """Deterministic init matching PyTorch parameter shapes (uniform(-1/sqrt(H), 1/sqrt(H)))."""
    ks = jax.random.split(key, 6)
    s = 1.0 / jnp.sqrt(jnp.float32(hidden_dim))
    w_ih = jax.random.uniform(ks[0], (4 * hidden_dim, input_dim), jnp.float32, -s, s)
    w_hh = jax.random.uniform(ks[1], (4 * hidden_dim, hidden_dim), jnp.float32, -s, s)
    b_ih = jax.random.uniform(ks[2], (4 * hidden_dim,), jnp.float32, -s, s)
    b_hh = jax.random.uniform(ks[3], (4 * hidden_dim,), jnp.float32, -s, s)
    w_fc = jax.random.uniform(ks[4], (output_dim, hidden_dim), jnp.float32, -s, s)
    b_fc = jax.random.uniform(ks[5], (output_dim,), jnp.float32, -s, s)
    return (w_ih, w_hh, b_ih, b_hh, w_fc, b_fc)


def seq2seq_reference(x, params):
    """Pure-JAX f32 reference of the PyTorch forward (lax.scan LSTM + fc on last step)."""
    w_ih, w_hh, b_ih, b_hh, w_fc, b_fc = params
    H = w_hh.shape[1]
    B = x.shape[0]
    x_tm = jnp.transpose(x, (1, 0, 2)).astype(jnp.float32)

    def step(carry, x_t):
        h, c = carry
        gates = (x_t @ w_ih.T + b_ih + h @ w_hh.T + b_hh)
        i_g = jax.nn.sigmoid(gates[:, 0 * H:1 * H])
        f_g = jax.nn.sigmoid(gates[:, 1 * H:2 * H])
        g_g = jnp.tanh(gates[:, 2 * H:3 * H])
        o_g = jax.nn.sigmoid(gates[:, 3 * H:4 * H])
        c_new = f_g * c + i_g * g_g
        h_new = o_g * jnp.tanh(c_new)
        return (h_new, c_new), None

    h0 = jnp.zeros((B, H), jnp.float32)
    c0 = jnp.zeros((B, H), jnp.float32)
    (h_last, _), _ = lax.scan(step, (h0, c0), x_tm)
    return h_last @ w_fc.T + b_fc


if __name__ == "__main__":
    key = jax.random.PRNGKey(0)
    k_x, k_p = jax.random.split(key)

    B, T, I = 4, 8, INPUT_DIM
    x = jax.random.normal(k_x, (B, T, I), jnp.float32)
    params = init_params(k_p)

    out = seq2seq_forward(x, params)
    out = jax.block_until_ready(out)

    ref = seq2seq_reference(x, params)
    assert out.shape == (B, OUTPUT_DIM)
    # Tolerance loosened from 1e-3: the recurrent matmul operands are bf16 (per the
    # performance review); rounding compounds over the T-step recurrence.
    assert jnp.allclose(out, ref, atol=2e-2, rtol=2e-2), "mismatch vs reference"

    print("KERNEL_OK")
</pallas_src>

<mosaic_0001>
module attributes {stable_mosaic.version = 11 : i64} {
  func.func @_lstm_fc_kernel(%arg0: i32, %arg1: memref<8x8x256xf32, #tpu.memory_space<vmem>>, %arg2: memref<64x256xbf16, #tpu.memory_space<vmem>>, %arg3: memref<64x128xf32, #tpu.memory_space<vmem>>, %arg4: memref<1x128xf32, #tpu.memory_space<vmem>>, %arg5: memref<8x128xf32, #tpu.memory_space<vmem>>) attributes {dimension_semantics = [#tpu.dimension_semantics<parallel>], iteration_bounds = array<i64: 1>, scalar_prefetch = 0 : i64, scratch_operands = 0 : i64, tpu.core_type = #tpu.core_type<tc>, window_params = [{transform_indices = @transform_0, window_bounds = array<i64: 8, 8, 256>}, {pipeline_mode = #tpu.pipeline_mode<synchronous>, transform_indices = @transform_1, window_bounds = array<i64: 64, 256>}, {pipeline_mode = #tpu.pipeline_mode<synchronous>, transform_indices = @transform_2, window_bounds = array<i64: 64, 128>}, {pipeline_mode = #tpu.pipeline_mode<synchronous>, transform_indices = @transform_3, window_bounds = array<i64: 1, 128>}, {transform_indices = @transform_4, window_bounds = array<i64: 8, 128>}]} {
    %c0 = arith.constant 0 : index
    %c0_0 = arith.constant 0 : index
    %0 = vector.load %arg2[%c0, %c0_0] : memref<64x256xbf16, #tpu.memory_space<vmem>>, vector<64x256xbf16>
    %cst = arith.constant 0.000000e+00 : f32
    %1 = vector.broadcast %cst : f32 to vector<8x64xf32>
    %cst_1 = arith.constant 0.000000e+00 : f32
    %2 = vector.broadcast %cst_1 : f32 to vector<8x64xf32>
    %c0_i32 = arith.constant 0 : i32
    %3 = arith.index_cast %c0_i32 : i32 to index
    %c0_2 = arith.constant 0 : index
    %c0_3 = arith.constant 0 : index
    %4 = vector.load %arg1[%3, %c0_2, %c0_3] : memref<8x8x256xf32, #tpu.memory_space<vmem>>, vector<1x8x256xf32>
    %5 = vector.shape_cast %4 : vector<1x8x256xf32> to vector<8x256xf32>
    %6 = arith.truncf %1 : vector<8x64xf32> to vector<8x64xbf16>
    %cst_4 = arith.constant dense<0.000000e+00> : vector<8x256xf32>
    %7 = tpu.matmul %6, %0, %cst_4 {dimension_numbers = #tpu.dot_dimension_numbers<[1], [0], [0], [1], [0, 0, 1, 1], [], []>} : vector<8x64xbf16>, vector<64x256xbf16>, vector<8x256xf32> -> vector<8x256xf32>
    %8 = arith.addf %5, %7 : vector<8x256xf32>
    %9 = vector.extract_strided_slice %8 {offsets = [0, 0], sizes = [8, 192], strides = [1, 1]} : vector<8x256xf32> to vector<8x192xf32>
    %cst_5 = arith.constant 5.000000e-01 : f32
    %10 = vector.broadcast %cst_5 : f32 to vector<8x192xf32>
    %11 = arith.mulf %10, %9 : vector<8x192xf32>
    %12 = math.tanh %11 : vector<8x192xf32>
    %cst_6 = arith.constant 5.000000e-01 : f32
    %13 = vector.broadcast %cst_6 : f32 to vector<8x192xf32>
    %14 = arith.mulf %13, %12 : vector<8x192xf32>
    %cst_7 = arith.constant 5.000000e-01 : f32
    %15 = vector.broadcast %cst_7 : f32 to vector<8x192xf32>
    %16 = arith.addf %14, %15 : vector<8x192xf32>
    %17 = vector.extract_strided_slice %16 {offsets = [0, 0], sizes = [8, 64], strides = [1, 1]} : vector<8x192xf32> to vector<8x64xf32>
    %18 = vector.extract_strided_slice %16 {offsets = [0, 64], sizes = [8, 64], strides = [1, 1]} : vector<8x192xf32> to vector<8x64xf32>
    %19 = vector.extract_strided_slice %16 {offsets = [0, 128], sizes = [8, 64], strides = [1, 1]} : vector<8x192xf32> to vector<8x64xf32>
    %20 = vector.extract_strided_slice %8 {offsets = [0, 192], sizes = [8, 64], strides = [1, 1]} : vector<8x256xf32> to vector<8x64xf32>
    %21 = math.tanh %20 : vector<8x64xf32>
    %22 = arith.mulf %18, %2 : vector<8x64xf32>
    %23 = arith.mulf %17, %21 : vector<8x64xf32>
    %24 = arith.addf %22, %23 : vector<8x64xf32>
    %25 = math.tanh %24 : vector<8x64xf32>
    %26 = arith.mulf %19, %25 : vector<8x64xf32>
    %c1_i32 = arith.constant 1 : i32
    %27 = arith.index_cast %c1_i32 : i32 to index
    %c0_8 = arith.constant 0 : index
    %c0_9 = arith.constant 0 : index
    %28 = vector.load %arg1[%27, %c0_8, %c0_9] : memref<8x8x256xf32, #tpu.memory_space<vmem>>, vector<1x8x256xf32>
    %29 = vector.shape_cast %28 : vector<1x8x256xf32> to vector<8x256xf32>
    %30 = arith.truncf %26 : vector<8x64xf32> to vector<8x64xbf16>
    %cst_10 = arith.constant dense<0.000000e+00> : vector<8x256xf32>
    %31 = tpu.matmul %30, %0, %cst_10 {dimension_numbers = #tpu.dot_dimension_numbers<[1], [0], [0], [1], [0, 0, 1, 1], [], []>} : vector<8x64xbf16>, vector<64x256xbf16>, vector<8x256xf32> -> vector<8x256xf32>
    %32 = arith.addf %29, %31 : vector<8x256xf32>
    %33 = vector.extract_strided_slice %32 {offsets = [0, 0], sizes = [8, 192], strides = [1, 1]} : vector<8x256xf32> to vector<8x192xf32>
    %cst_11 = arith.constant 5.000000e-01 : f32
    %34 = vector.broadcast %cst_11 : f32 to vector<8x192xf32>
    %35 = arith.mulf %34, %33 : vector<8x192xf32>
    %36 = math.tanh %35 : vector<8x192xf32>
    %cst_12 = arith.constant 5.000000e-01 : f32
    %37 = vector.broadcast %cst_12 : f32 to vector<8x192xf32>
    %38 = arith.mulf %37, %36 : vector<8x192xf32>
    %cst_13 = arith.constant 5.000000e-01 : f32
    %39 = vector.broadcast %cst_13 : f32 to vector<8x192xf32>
    %40 = arith.addf %38, %39 : vector<8x192xf32>
    %41 = vector.extract_strided_slice %40 {offsets = [0, 0], sizes = [8, 64], strides = [1, 1]} : vector<8x192xf32> to vector<8x64xf32>
    %42 = vector.extract_strided_slice %40 {offsets = [0, 64], sizes = [8, 64], strides = [1, 1]} : vector<8x192xf32> to vector<8x64xf32>
    %43 = vector.extract_strided_slice %40 {offsets = [0, 128], sizes = [8, 64], strides = [1, 1]} : vector<8x192xf32> to vector<8x64xf32>
    %44 = vector.extract_strided_slice %32 {offsets = [0, 192], sizes = [8, 64], strides = [1, 1]} : vector<8x256xf32> to vector<8x64xf32>
    %45 = math.tanh %44 : vector<8x64xf32>
    %46 = arith.mulf %42, %24 : vector<8x64xf32>
    %47 = arith.mulf %41, %45 : vector<8x64xf32>
    %48 = arith.addf %46, %47 : vector<8x64xf32>
    %49 = math.tanh %48 : vector<8x64xf32>
    %50 = arith.mulf %43, %49 : vector<8x64xf32>
    %c2_i32 = arith.constant 2 : i32
    %51 = arith.index_cast %c2_i32 : i32 to index
    %c0_14 = arith.constant 0 : index
    %c0_15 = arith.constant 0 : index
    %52 = vector.load %arg1[%51, %c0_14, %c0_15] : memref<8x8x256xf32, #tpu.memory_space<vmem>>, vector<1x8x256xf32>
    %53 = vector.shape_cast %52 : vector<1x8x256xf32> to vector<8x256xf32>
    %54 = arith.truncf %50 : vector<8x64xf32> to vector<8x64xbf16>
    %cst_16 = arith.constant dense<0.000000e+00> : vector<8x256xf32>
    %55 = tpu.matmul %54, %0, %cst_16 {dimension_numbers = #tpu.dot_dimension_numbers<[1], [0], [0], [1], [0, 0, 1, 1], [], []>} : vector<8x64xbf16>, vector<64x256xbf16>, vector<8x256xf32> -> vector<8x256xf32>
    %56 = arith.addf %53, %55 : vector<8x256xf32>
    %57 = vector.extract_strided_slice %56 {offsets = [0, 0], sizes = [8, 192], strides = [1, 1]} : vector<8x256xf32> to vector<8x192xf32>
    %cst_17 = arith.constant 5.000000e-01 : f32
    %58 = vector.broadcast %cst_17 : f32 to vector<8x192xf32>
    %59 = arith.mulf %58, %57 : vector<8x192xf32>
    %60 = math.tanh %59 : vector<8x192xf32>
    %cst_18 = arith.constant 5.000000e-01 : f32
    %61 = vector.broadcast %cst_18 : f32 to vector<8x192xf32>
    %62 = arith.mulf %61, %60 : vector<8x192xf32>
    %cst_19 = arith.constant 5.000000e-01 : f32
    %63 = vector.broadcast %cst_19 : f32 to vector<8x192xf32>
    %64 = arith.addf %62, %63 : vector<8x192xf32>
    %65 = vector.extract_strided_slice %64 {offsets = [0, 0], sizes = [8, 64], strides = [1, 1]} : vector<8x192xf32> to vector<8x64xf32>
    %66 = vector.extract_strided_slice %64 {offsets = [0, 64], sizes = [8, 64], strides = [1, 1]} : vector<8x192xf32> to vector<8x64xf32>
    %67 = vector.extract_strided_slice %64 {offsets = [0, 128], sizes = [8, 64], strides = [1, 1]} : vector<8x192xf32> to vector<8x64xf32>
    %68 = vector.extract_strided_slice %56 {offsets = [0, 192], sizes = [8, 64], strides = [1, 1]} : vector<8x256xf32> to vector<8x64xf32>
    %69 = math.tanh %68 : vector<8x64xf32>
    %70 = arith.mulf %66, %48 : vector<8x64xf32>
    %71 = arith.mulf %65, %69 : vector<8x64xf32>
    %72 = arith.addf %70, %71 : vector<8x64xf32>
    %73 = math.tanh %72 : vector<8x64xf32>
    %74 = arith.mulf %67, %73 : vector<8x64xf32>
    %c3_i32 = arith.constant 3 : i32
    %75 = arith.index_cast %c3_i32 : i32 to index
    %c0_20 = arith.constant 0 : index
    %c0_21 = arith.constant 0 : index
    %76 = vector.load %arg1[%75, %c0_20, %c0_21] : memref<8x8x256xf32, #tpu.memory_space<vmem>>, vector<1x8x256xf32>
    %77 = vector.shape_cast %76 : vector<1x8x256xf32> to vector<8x256xf32>
    %78 = arith.truncf %74 : vector<8x64xf32> to vector<8x64xbf16>
    %cst_22 = arith.constant dense<0.000000e+00> : vector<8x256xf32>
    %79 = tpu.matmul %78, %0, %cst_22 {dimension_numbers = #tpu.dot_dimension_numbers<[1], [0], [0], [1], [0, 0, 1, 1], [], []>} : vector<8x64xbf16>, vector<64x256xbf16>, vector<8x256xf32> -> vector<8x256xf32>
    %80 = arith.addf %77, %79 : vector<8x256xf32>
    %81 = vector.extract_strided_slice %80 {offsets = [0, 0], sizes = [8, 192], strides = [1, 1]} : vector<8x256xf32> to vector<8x192xf32>
    %cst_23 = arith.constant 5.000000e-01 : f32
    %82 = vector.broadcast %cst_23 : f32 to vector<8x192xf32>
    %83 = arith.mulf %82, %81 : vector<8x192xf32>
    %84 = math.tanh %83 : vector<8x192xf32>
    %cst_24 = arith.constant 5.000000e-01 : f32
    %85 = vector.broadcast %cst_24 : f32 to vector<8x192xf32>
    %86 = arith.mulf %85, %84 : vector<8x192xf32>
    %cst_25 = arith.constant 5.000000e-01 : f32
    %87 = vector.broadcast %cst_25 : f32 to vector<8x192xf32>
    %88 = arith.addf %86, %87 : vector<8x192xf32>
    %89 = vector.extract_strided_slice %88 {offsets = [0, 0], sizes = [8, 64], strides = [1, 1]} : vector<8x192xf32> to vector<8x64xf32>
    %90 = vector.extract_strided_slice %88 {offsets = [0, 64], sizes = [8, 64], strides = [1, 1]} : vector<8x192xf32> to vector<8x64xf32>
    %91 = vector.extract_strided_slice %88 {offsets = [0, 128], sizes = [8, 64], strides = [1, 1]} : vector<8x192xf32> to vector<8x64xf32>
    %92 = vector.extract_strided_slice %80 {offsets = [0, 192], sizes = [8, 64], strides = [1, 1]} : vector<8x256xf32> to vector<8x64xf32>
    %93 = math.tanh %92 : vector<8x64xf32>
    %94 = arith.mulf %90, %72 : vector<8x64xf32>
    %95 = arith.mulf %89, %93 : vector<8x64xf32>
    %96 = arith.addf %94, %95 : vector<8x64xf32>
    %97 = math.tanh %96 : vector<8x64xf32>
    %98 = arith.mulf %91, %97 : vector<8x64xf32>
    %c4_i32 = arith.constant 4 : i32
    %99 = arith.index_cast %c4_i32 : i32 to index
    %c0_26 = arith.constant 0 : index
    %c0_27 = arith.constant 0 : index
    %100 = vector.load %arg1[%99, %c0_26, %c0_27] : memref<8x8x256xf32, #tpu.memory_space<vmem>>, vector<1x8x256xf32>
    %101 = vector.shape_cast %100 : vector<1x8x256xf32> to vector<8x256xf32>
    %102 = arith.truncf %98 : vector<8x64xf32> to vector<8x64xbf16>
    %cst_28 = arith.constant dense<0.000000e+00> : vector<8x256xf32>
    %103 = tpu.matmul %102, %0, %cst_28 {dimension_numbers = #tpu.dot_dimension_numbers<[1], [0], [0], [1], [0, 0, 1, 1], [], []>} : vector<8x64xbf16>, vector<64x256xbf16>, vector<8x256xf32> -> vector<8x256xf32>
    %104 = arith.addf %101, %103 : vector<8x256xf32>
    %105 = vector.extract_strided_slice %104 {offsets = [0, 0], sizes = [8, 192], strides = [1, 1]} : vector<8x256xf32> to vector<8x192xf32>
    %cst_29 = arith.constant 5.000000e-01 : f32
    %106 = vector.broadcast %cst_29 : f32 to vector<8x192xf32>
    %107 = arith.mulf %106, %105 : vector<8x192xf32>
    %108 = math.tanh %107 : vector<8x192xf32>
    %cst_30 = arith.constant 5.000000e-01 : f32
    %109 = vector.broadcast %cst_30 : f32 to vector<8x192xf32>
    %110 = arith.mulf %109, %108 : vector<8x192xf32>
    %cst_31 = arith.constant 5.000000e-01 : f32
    %111 = vector.broadcast %cst_31 : f32 to vector<8x192xf32>
    %112 = arith.addf %110, %111 : vector<8x192xf32>
    %113 = vector.extract_strided_slice %112 {offsets = [0, 0], sizes = [8, 64], strides = [1, 1]} : vector<8x192xf32> to vector<8x64xf32>
    %114 = vector.extract_strided_slice %112 {offsets = [0, 64], sizes = [8, 64], strides = [1, 1]} : vector<8x192xf32> to vector<8x64xf32>
    %115 = vector.extract_strided_slice %112 {offsets = [0, 128], sizes = [8, 64], strides = [1, 1]} : vector<8x192xf32> to vector<8x64xf32>
    %116 = vector.extract_strided_slice %104 {offsets = [0, 192], sizes = [8, 64], strides = [1, 1]} : vector<8x256xf32> to vector<8x64xf32>
    %117 = math.tanh %116 : vector<8x64xf32>
    %118 = arith.mulf %114, %96 : vector<8x64xf32>
    %119 = arith.mulf %113, %117 : vector<8x64xf32>
    %120 = arith.addf %118, %119 : vector<8x64xf32>
    %121 = math.tanh %120 : vector<8x64xf32>
    %122 = arith.mulf %115, %121 : vector<8x64xf32>
    %c5_i32 = arith.constant 5 : i32
    %123 = arith.index_cast %c5_i32 : i32 to index
    %c0_32 = arith.constant 0 : index
    %c0_33 = arith.constant 0 : index
    %124 = vector.load %arg1[%123, %c0_32, %c0_33] : memref<8x8x256xf32, #tpu.memory_space<vmem>>, vector<1x8x256xf32>
    %125 = vector.shape_cast %124 : vector<1x8x256xf32> to vector<8x256xf32>
    %126 = arith.truncf %122 : vector<8x64xf32> to vector<8x64xbf16>
    %cst_34 = arith.constant dense<0.000000e+00> : vector<8x256xf32>
    %127 = tpu.matmul %126, %0, %cst_34 {dimension_numbers = #tpu.dot_dimension_numbers<[1], [0], [0], [1], [0, 0, 1, 1], [], []>} : vector<8x64xbf16>, vector<64x256xbf16>, vector<8x256xf32> -> vector<8x256xf32>
    %128 = arith.addf %125, %127 : vector<8x256xf32>
    %129 = vector.extract_strided_slice %128 {offsets = [0, 0], sizes = [8, 192], strides = [1, 1]} : vector<8x256xf32> to vector<8x192xf32>
    %cst_35 = arith.constant 5.000000e-01 : f32
    %130 = vector.broadcast %cst_35 : f32 to vector<8x192xf32>
    %131 = arith.mulf %130, %129 : vector<8x192xf32>
    %132 = math.tanh %131 : vector<8x192xf32>
    %cst_36 = arith.constant 5.000000e-01 : f32
    %133 = vector.broadcast %cst_36 : f32 to vector<8x192xf32>
    %134 = arith.mulf %133, %132 : vector<8x192xf32>
    %cst_37 = arith.constant 5.000000e-01 : f32
    %135 = vector.broadcast %cst_37 : f32 to vector<8x192xf32>
    %136 = arith.addf %134, %135 : vector<8x192xf32>
    %137 = vector.extract_strided_slice %136 {offsets = [0, 0], sizes = [8, 64], strides = [1, 1]} : vector<8x192xf32> to vector<8x64xf32>
    %138 = vector.extract_strided_slice %136 {offsets = [0, 64], sizes = [8, 64], strides = [1, 1]} : vector<8x192xf32> to vector<8x64xf32>
    %139 = vector.extract_strided_slice %136 {offsets = [0, 128], sizes = [8, 64], strides = [1, 1]} : vector<8x192xf32> to vector<8x64xf32>
    %140 = vector.extract_strided_slice %128 {offsets = [0, 192], sizes = [8, 64], strides = [1, 1]} : vector<8x256xf32> to vector<8x64xf32>
    %141 = math.tanh %140 : vector<8x64xf32>
    %142 = arith.mulf %138, %120 : vector<8x64xf32>
    %143 = arith.mulf %137, %141 : vector<8x64xf32>
    %144 = arith.addf %142, %143 : vector<8x64xf32>
    %145 = math.tanh %144 : vector<8x64xf32>
    %146 = arith.mulf %139, %145 : vector<8x64xf32>
    %c6_i32 = arith.constant 6 : i32
    %147 = arith.index_cast %c6_i32 : i32 to index
    %c0_38 = arith.constant 0 : index
    %c0_39 = arith.constant 0 : index
    %148 = vector.load %arg1[%147, %c0_38, %c0_39] : memref<8x8x256xf32, #tpu.memory_space<vmem>>, vector<1x8x256xf32>
    %149 = vector.shape_cast %148 : vector<1x8x256xf32> to vector<8x256xf32>
    %150 = arith.truncf %146 : vector<8x64xf32> to vector<8x64xbf16>
    %cst_40 = arith.constant dense<0.000000e+00> : vector<8x256xf32>
    %151 = tpu.matmul %150, %0, %cst_40 {dimension_numbers = #tpu.dot_dimension_numbers<[1], [0], [0], [1], [0, 0, 1, 1], [], []>} : vector<8x64xbf16>, vector<64x256xbf16>, vector<8x256xf32> -> vector<8x256xf32>
    %152 = arith.addf %149, %151 : vector<8x256xf32>
    %153 = vector.extract_strided_slice %152 {offsets = [0, 0], sizes = [8, 192], strides = [1, 1]} : vector<8x256xf32> to vector<8x192xf32>
    %cst_41 = arith.constant 5.000000e-01 : f32
    %154 = vector.broadcast %cst_41 : f32 to vector<8x192xf32>
    %155 = arith.mulf %154, %153 : vector<8x192xf32>
    %156 = math.tanh %155 : vector<8x192xf32>
    %cst_42 = arith.constant 5.000000e-01 : f32
    %157 = vector.broadcast %cst_42 : f32 to vector<8x192xf32>
    %158 = arith.mulf %157, %156 : vector<8x192xf32>
    %cst_43 = arith.constant 5.000000e-01 : f32
    %159 = vector.broadcast %cst_43 : f32 to vector<8x192xf32>
    %160 = arith.addf %158, %159 : vector<8x192xf32>
    %161 = vector.extract_strided_slice %160 {offsets = [0, 0], sizes = [8, 64], strides = [1, 1]} : vector<8x192xf32> to vector<8x64xf32>
    %162 = vector.extract_strided_slice %160 {offsets = [0, 64], sizes = [8, 64], strides = [1, 1]} : vector<8x192xf32> to vector<8x64xf32>
    %163 = vector.extract_strided_slice %160 {offsets = [0, 128], sizes = [8, 64], strides = [1, 1]} : vector<8x192xf32> to vector<8x64xf32>
    %164 = vector.extract_strided_slice %152 {offsets = [0, 192], sizes = [8, 64], strides = [1, 1]} : vector<8x256xf32> to vector<8x64xf32>
    %165 = math.tanh %164 : vector<8x64xf32>
    %166 = arith.mulf %162, %144 : vector<8x64xf32>
    %167 = arith.mulf %161, %165 : vector<8x64xf32>
    %168 = arith.addf %166, %167 : vector<8x64xf32>
    %169 = math.tanh %168 : vector<8x64xf32>
    %170 = arith.mulf %163, %169 : vector<8x64xf32>
    %c7_i32 = arith.constant 7 : i32
    %171 = arith.index_cast %c7_i32 : i32 to index
    %c0_44 = arith.constant 0 : index
    %c0_45 = arith.constant 0 : index
    %172 = vector.load %arg1[%171, %c0_44, %c0_45] : memref<8x8x256xf32, #tpu.memory_space<vmem>>, vector<1x8x256xf32>
    %173 = vector.shape_cast %172 : vector<1x8x256xf32> to vector<8x256xf32>
    %174 = arith.truncf %170 : vector<8x64xf32> to vector<8x64xbf16>
    %cst_46 = arith.constant dense<0.000000e+00> : vector<8x256xf32>
    %175 = tpu.matmul %174, %0, %cst_46 {dimension_numbers = #tpu.dot_dimension_numbers<[1], [0], [0], [1], [0, 0, 1, 1], [], []>} : vector<8x64xbf16>, vector<64x256xbf16>, vector<8x256xf32> -> vector<8x256xf32>
    %176 = arith.addf %173, %175 : vector<8x256xf32>
    %177 = vector.extract_strided_slice %176 {offsets = [0, 0], sizes = [8, 192], strides = [1, 1]} : vector<8x256xf32> to vector<8x192xf32>
    %cst_47 = arith.constant 5.000000e-01 : f32
    %178 = vector.broadcast %cst_47 : f32 to vector<8x192xf32>
    %179 = arith.mulf %178, %177 : vector<8x192xf32>
    %180 = math.tanh %179 : vector<8x192xf32>
    %cst_48 = arith.constant 5.000000e-01 : f32
    %181 = vector.broadcast %cst_48 : f32 to vector<8x192xf32>
    %182 = arith.mulf %181, %180 : vector<8x192xf32>
    %cst_49 = arith.constant 5.000000e-01 : f32
    %183 = vector.broadcast %cst_49 : f32 to vector<8x192xf32>
    %184 = arith.addf %182, %183 : vector<8x192xf32>
    %185 = vector.extract_strided_slice %184 {offsets = [0, 0], sizes = [8, 64], strides = [1, 1]} : vector<8x192xf32> to vector<8x64xf32>
    %186 = vector.extract_strided_slice %184 {offsets = [0, 64], sizes = [8, 64], strides = [1, 1]} : vector<8x192xf32> to vector<8x64xf32>
    %187 = vector.extract_strided_slice %184 {offsets = [0, 128], sizes = [8, 64], strides = [1, 1]} : vector<8x192xf32> to vector<8x64xf32>
    %188 = vector.extract_strided_slice %176 {offsets = [0, 192], sizes = [8, 64], strides = [1, 1]} : vector<8x256xf32> to vector<8x64xf32>
    %189 = math.tanh %188 : vector<8x64xf32>
    %190 = arith.mulf %186, %168 : vector<8x64xf32>
    %191 = arith.mulf %185, %189 : vector<8x64xf32>
    %192 = arith.addf %190, %191 : vector<8x64xf32>
    %193 = math.tanh %192 : vector<8x64xf32>
    %194 = arith.mulf %187, %193 : vector<8x64xf32>
    %c8_i32 = arith.constant 8 : i32
    %c0_50 = arith.constant 0 : index
    %c0_51 = arith.constant 0 : index
    %195 = vector.load %arg3[%c0_50, %c0_51] : memref<64x128xf32, #tpu.memory_space<vmem>>, vector<64x128xf32>
    %cst_52 = arith.constant dense<0.000000e+00> : vector<8x128xf32>
    %196 = tpu.matmul %194, %195, %cst_52 {dimension_numbers = #tpu.dot_dimension_numbers<[1], [0], [0], [1], [0, 0, 1, 1], [], []>} : vector<8x64xf32>, vector<64x128xf32>, vector<8x128xf32> -> vector<8x128xf32>
    %c0_53 = arith.constant 0 : index
    %c0_54 = arith.constant 0 : index
    %197 = vector.load %arg4[%c0_53, %c0_54] : memref<1x128xf32, #tpu.memory_space<vmem>>, vector<1x128xf32>
    %198 = vector.broadcast %197 : vector<1x128xf32> to vector<8x128xf32>
    %199 = arith.addf %196, %198 : vector<8x128xf32>
    %c0_55 = arith.constant 0 : index
    %c0_56 = arith.constant 0 : index
    %200 = vector.load %arg5[%c0_55, %c0_56] : memref<8x128xf32, #tpu.memory_space<vmem>>, vector<8x128xf32>
    tpu.vector_store %arg5[%c0_55, %c0_56], %199 {strides = array<i32>} : memref<8x128xf32, #tpu.memory_space<vmem>>, vector<8x128xf32>,
    return
  }
  func.func @transform_0(%arg0: i32) -> (i32, i32, i32) {
    %c0_i32 = arith.constant 0 : i32
    %c0_i32_0 = arith.constant 0 : i32
    %c0_i32_1 = arith.constant 0 : i32
    return %c0_i32, %arg0, %c0_i32_0 : i32, i32, i32
  }
  func.func @transform_1(%arg0: i32) -> (i32, i32) {
    %c0_i32 = arith.constant 0 : i32
    %c0_i32_0 = arith.constant 0 : i32
    %c0_i32_1 = arith.constant 0 : i32
    return %c0_i32, %c0_i32_0 : i32, i32
  }
  func.func @transform_2(%arg0: i32) -> (i32, i32) {
    %c0_i32 = arith.constant 0 : i32
    %c0_i32_0 = arith.constant 0 : i32
    %c0_i32_1 = arith.constant 0 : i32
    return %c0_i32, %c0_i32_0 : i32, i32
  }
  func.func @transform_3(%arg0: i32) -> (i32, i32) {
    %c0_i32 = arith.constant 0 : i32
    %c0_i32_0 = arith.constant 0 : i32
    %c0_i32_1 = arith.constant 0 : i32
    return %c0_i32, %c0_i32_0 : i32, i32
  }
  func.func @transform_4(%arg0: i32) -> (i32, i32) {
    %c0_i32 = arith.constant 0 : i32
    %c0_i32_0 = arith.constant 0 : i32
    return %arg0, %c0_i32 : i32, i32
  }
}

</mosaic_0001>

<bundles_post_ra>
// kernel: tpu_custom_call.1
= control target key start
LH: loop header
LB: loop body
LE: loop exit
PB: predicated region body
PF: predicated region fallthrough
CT: control target
= control target key end

     0   :  { %9 = vsyncpa [#allocation3], 0  ;;  %s1056_s0 = inlined_call_operand.hbm [shape: f32[8,8,256], index: 0, kind: input, shape index: {}]   ;;  %s1057_s1 = inlined_call_operand.hbm [shape: bf16[64,256], index: 1, kind: input, shape index: {}]   ;;  %s1058_s2 = inlined_call_operand.hbm [shape: f32[64,128], index: 2, kind: input, shape index: {}]   ;;  %s1059_s3 = inlined_call_operand.vmem [shape: f32[1,128], index: 3, kind: input, shape index: {}]   ;;  %s1060_s4 = inlined_call_operand.hbm [shape: f32[8,128], index: 4, kind: output, shape index: {}]  }
   0x1   :  { %10 = vsyncpa [#allocation6], 0  ;;  %s29_s17 = sshll.u32 %s1057_s1, 4  ;;  %s30_s17 = int_to_ptr.hbm [resolvable:$true] %s29_s17 }
   0x2   :  { %11 = vsyncpa [#allocation4], 0  ;;  %s887_s18 = smov [#allocation5]   ;;  %s16_s22 = sshll.u32 %s1056_s0, 4  ;;  %s17_s22 = int_to_ptr.hbm [resolvable:$true] %s16_s22 }
   0x3   :  { %s31_s19 = sshll.u32 %s887_s18, 4  ;;  %s888_s23 = smov 128   ;;  %s32_s19 = int_to_ptr.vmem [resolvable:$true] %s31_s19 }
   0x4   :  { %s889_s24 = smov 8   ;;  %s890_s25 = smov [#allocation2]  }
   0x5   :  { %37 = dma.hbm_to_vmem [thread:$0]  %s30_s17, 1024, %s32_s19, [#allocation6], %s888_s23, %s888_s23, %s889_s24  }
   0x6   :  { %s18_s26 = sshll.u32 %s890_s25, 4  ;;  %s891_s27 = smov 256   ;;  %s19_s26 = int_to_ptr.vmem [resolvable:$true] %s18_s26 }
   0x7   :  { %s892_s28 = smov 16   ;;  %s42_s30 = sshll.u32 %s1058_s2, 4  ;;  %s43_s30 = int_to_ptr.hbm [resolvable:$true] %s42_s30 }
   0x8   :  { %24 = dma.hbm_to_vmem [thread:$0]  %s17_s22, 2048, %s19_s26, [#allocation3], %s891_s27, %s891_s27, %s892_s28  }
   0x9   :  { %s893_s5 = smov [#allocation7]  }
   0xa   :  { %s44_s6 = sshll.u32 %s893_s5, 4  ;;  %s45_s6 = int_to_ptr.vmem [resolvable:$true] %s44_s6 }
   0xb   :  { %50 = dma.hbm_to_vmem [thread:$0]  %s43_s30, 1024, %s45_s6, [#allocation6], %s888_s23, %s888_s23, %s889_s24  }
   0xc   :  { %881 = dma.done.wait [#allocation3], 2048  }
   0xd   :  { %882 = vsyncadd [#allocation3], 4294965248 }
   0xe   :  { %883 = dma.done.wait [#allocation6], 2048  }
   0xf   :  { %884 = vsyncadd [#allocation6], 4294965248  ;;  %v708_v0 = vld [vmem:[#allocation5 + $0x34] sm:$0xf]  ;;  %v683_v1 = vld [vmem:[#allocation5 + $0x38] sm:$0xf0] }
  0x10   :  { %v706_v2 = vld [vmem:[#allocation5 + $0x24] sm:$0xf]  ;;  %v931_v3 = vor.u32 %v708_v0, %v683_v1  ;;  %v675_v4 = vld [vmem:[#allocation5 + $0x28] sm:$0xf0]  ;;  %v681_v5 = vld [vmem:[#allocation5 + $0x30] sm:$0xf] }
  0x11   :  { %v934_v6 = vor.u32 %v706_v2, %v675_v4  ;;  %v709_v7 = vld [vmem:[#allocation5 + $0x34] sm:$0xf0]  ;;  %v673_v8 = vld [vmem:[#allocation5 + $0x20] sm:$0xf]  ;;  %v707_v9 = vld [vmem:[#allocation5 + $0x24] sm:$0xf0] }
  0x12   :  { %137 = vmatpush.bf16.msra.mxu1 %v931_v3  ;;  %198 = vmatpush.bf16.msra.mxu3 %v931_v3  ;;  %v704_v10 = vld [vmem:[#allocation5 + $0x14] sm:$0xf]  ;;  %v667_v11 = vld [vmem:[#allocation5 + $0x18] sm:$0xf0]  ;;  %v937_v12 = vor.u32 %v709_v7, %v681_v5  ;;  %v940_v13 = vor.u32 %v707_v9, %v673_v8  ;;  %v665_v15 = vld [vmem:[#allocation5 + $0x10] sm:$0xf] }
  0x13   :  { %v944_v14 = vor.u32 %v704_v10, %v667_v11  ;;  %v705_v16 = vld [vmem:[#allocation5 + $0x14] sm:$0xf0]  ;;  %v702_v17 = vld [vmem:[#allocation5 + $0x4] sm:$0xf]  ;;  %v659_v18 = vld [vmem:[#allocation5 + $0x8] sm:$0xf0] }
  0x14   :  { %124 = vmatpush.bf16.msra.mxu0 %v937_v12  ;;  %185 = vmatpush.bf16.msra.mxu2 %v937_v12  ;;  %v948_v19 = vor.u32 %v705_v16, %v665_v15  ;;  %v952_v20 = vor.u32 %v702_v17, %v659_v18  ;;  %v657_v21 = vld [vmem:[#allocation5] sm:$0xf]  ;;  %v703_v22 = vld [vmem:[#allocation5 + $0x4] sm:$0xf0]  ;;  %v894_v24 = vmov 0   ;;  %s895_s0 = smov 64  }
  0x15   :  { %v956_v23 = vor.u32 %v703_v22, %v657_v21  ;;  %v75_v25 = vld [vmem:[#allocation2 + $0x8] sm:$0xff]  ;;  %v74_v32 = vld [vmem:[#allocation2] sm:$0xff]  ;;  %vm116_vm0 = vcmask 523264   ;;  %v176_v51 = vld [vmem:[#allocation2 + $0x18] sm:$0xff]  ;;  %s896_s8 = smov [#allocation8]   ;;  %s644_s12 = sshll.u32 %s1060_s4, 4  ;;  %s645_s12 = int_to_ptr.hbm [resolvable:$true] %s644_s12 }
  0x16   :  { %138 = vmatpush.bf16.msra.mxu1 %v934_v6  ;;  %199 = vmatpush.bf16.msra.mxu3 %v934_v6  ;;  %v175_v58 = vld [vmem:[#allocation2 + $0x10] sm:$0xff]  ;;  %v237_v18 = vld [vmem:[#allocation2 + $0x28] sm:$0xff]  ;;  %s642_s9 = sshll.u32 %s896_s8, 4  ;;  %s643_s9 = int_to_ptr.vmem [resolvable:$true] %s642_s9 }
  0x18   :  { %125 = vmatpush.bf16.msra.mxu0 %v940_v13  ;;  %186 = vmatpush.bf16.msra.mxu2 %v940_v13 }
  0x1a   :  { %139 = vmatpush.bf16.msra.mxu1 %v944_v14  ;;  %200 = vmatpush.bf16.msra.mxu3 %v944_v14 }
  0x1c   :  { %126 = vmatpush.bf16.msra.mxu0 %v948_v19  ;;  %187 = vmatpush.bf16.msra.mxu2 %v948_v19 }
  0x1e   :  { %140 = vmatpush.bf16.msra.mxu1 %v952_v20  ;;  %201 = vmatpush.bf16.msra.mxu3 %v952_v20 }
  0x20   :  { %127 = vmatpush.bf16.msra.mxu0 %v956_v23  ;;  %188 = vmatpush.bf16.msra.mxu2 %v956_v23 }
  0x21   :  { %141 = vmatmul.bf16.vlgmr.msra.gmra.mxu1 %v894_v24 }
  0x22   :  { %259 = vmatpush.bf16.msrb.mxu1 %v931_v3  ;;  %320 = vmatpush.bf16.msrb.mxu3 %v931_v3 }
  0x23   :  { %128 = vmatmul.bf16.vlgmr.msra.gmra.mxu0 %v894_v24 }
  0x24   :  { %246 = vmatpush.bf16.msrb.mxu0 %v937_v12  ;;  %307 = vmatpush.bf16.msrb.mxu2 %v937_v12 }
  0x26   :  { %260 = vmatpush.bf16.msrb.mxu1 %v934_v6  ;;  %321 = vmatpush.bf16.msrb.mxu3 %v934_v6 }
  0x28   :  { %247 = vmatpush.bf16.msrb.mxu0 %v940_v13  ;;  %308 = vmatpush.bf16.msrb.mxu2 %v940_v13 }
  0x2a   :  { %261 = vmatpush.bf16.msrb.mxu1 %v944_v14  ;;  %322 = vmatpush.bf16.msrb.mxu3 %v944_v14 }
  0x2c   :  { %248 = vmatpush.bf16.msrb.mxu0 %v948_v19  ;;  %309 = vmatpush.bf16.msrb.mxu2 %v948_v19 }
  0x2e   :  { %262 = vmatpush.bf16.msrb.mxu1 %v952_v20  ;;  %323 = vmatpush.bf16.msrb.mxu3 %v952_v20 }
  0x30   :  { %249 = vmatpush.bf16.msrb.mxu0 %v956_v23  ;;  %310 = vmatpush.bf16.msrb.mxu2 %v956_v23 }
  0x32   :  { %381 = vmatpush.bf16.msra.mxu1 %v931_v3 }
  0x34   :  { %368 = vmatpush.bf16.msra.mxu0 %v937_v12 }
  0x36   :  { %382 = vmatpush.bf16.msra.mxu1 %v934_v6 }
  0x38   :  { %369 = vmatpush.bf16.msra.mxu0 %v940_v13 }
  0x3a   :  { %383 = vmatpush.bf16.msra.mxu1 %v944_v14 }
  0x3c   :  { %370 = vmatpush.bf16.msra.mxu0 %v948_v19 }
  0x3e   :  { %384 = vmatpush.bf16.msra.mxu1 %v952_v20 }
  0x40   :  { %371 = vmatpush.bf16.msra.mxu0 %v956_v23 }
  0x9e   :  { %v142_v26 = vpop.f32.mrf.mxu1 }
  0x9f   :  { %v147_v27 = vadd.f32 %v142_v26, %v75_v25 }
  0xa0   :  { %v129_v28 = vpop.f32.mrf.mxu0 }
  0xa1   :  { %721 = vtanh.f32 %v147_v27  ;;  %v146_v33 = vadd.f32 %v129_v28, %v74_v32  ;;  %v149_v44 = vmul.f32 0.5, %v147_v27  ;;  %v236_v28 = vld [vmem:[#allocation2 + $0x20] sm:$0xff] }
  0xa3   :  { %v148_v34 = vmul.f32 0.5, %v146_v33 }
  0xa5   :  { %723 = vtanh.f32 %v148_v34 }
  0xa6   :  { %v144_v29 = vpop.f32.mrf.mxu1 }
  0xa7   :  { %v722_v30 = vpop.eup %721 }
  0xa8   :  { %159 = vrot.lane.b32.xlu0 %v722_v30, %s895_s0  ;;  %v131_v31 = vpop.f32.mrf.mxu0 }
  0xab   :  { %v724_v35 = vpop.eup %723 }
  0xac   :  { %v152_v36 = vmul.f32 0.5, %v724_v35 }
  0xae   :  { %v154_v37 = vadd.f32 0.5, %v152_v36 }
  0xb0   :  { %v157_v40 = vmul.f32 0.0, %v154_v37 }
 0x11a   :  { %v160_v38 = vpop.permute.xlu0 %159 }
 0x11b   :  { %v162_v39 = vmul.f32 %v160_v38, %v154_v37 }
 0x11d   :  { %164 = vrot.lane.b32.xlu0 %v162_v39, %s895_s0 }
 0x18f   :  { %v165_v41 = vpop.permute.xlu0 %164 }
 0x190   :  { %v167_v42 = vadd.f32 %v165_v41, %v157_v40 }
 0x192   :  { %725 = vtanh.f32 %v167_v42 }
 0x193   :  { %727 = vtanh.f32 %v149_v44 }
 0x198   :  { %v726_v43 = vpop.eup %725 }
 0x199   :  { %170 = vrot.lane.b32.xlu1 %v726_v43, %s895_s0  ;;  %v728_v45 = vpop.eup %727 }
 0x19a   :  { %v153_v46 = vmul.f32 0.5, %v728_v45 }
 0x19c   :  { %v155_v47 = vadd.f32 0.5, %v153_v46 }
 0x20b   :  { %v171_v48 = vpop.permute.xlu1 %170 }
 0x20c   :  { %v173_v49 = vmul.f32 %v171_v48, %v155_v47  ;;  %v298_v47 = vld [vmem:[#allocation2 + $0x38] sm:$0xff] }
 0x20e   :  { %v177_v50 = vpack.c.bf16 %v173_v49, %v173_v49 }
 0x210   :  { %687 = vmatmul.msk.bf16.vlgmr.msra.gmra.mxu2 %vm116_vm0, %v177_v50  ;;  %688 = vmatmul.msk.bf16.vlgmr.msra.gmra.mxu3 %vm116_vm0, %v177_v50 }
 0x211   :  { %442 = vmatpush.bf16.msra.mxu3 %v931_v3  ;;  %429 = vmatpush.bf16.msra.mxu2 %v937_v12 }
 0x215   :  { %443 = vmatpush.bf16.msra.mxu3 %v934_v6  ;;  %430 = vmatpush.bf16.msra.mxu2 %v940_v13 }
 0x219   :  { %444 = vmatpush.bf16.msra.mxu3 %v944_v14  ;;  %431 = vmatpush.bf16.msra.mxu2 %v948_v19 }
 0x21d   :  { %445 = vmatpush.bf16.msra.mxu3 %v952_v20  ;;  %432 = vmatpush.bf16.msra.mxu2 %v956_v23 }
 0x293   :  { %v190_v52 = vpop.f32.mrf.mxu2  ;;  %v203_v53 = vpop.f32.mrf.mxu3 }
 0x294   :  { %v208_v54 = vadd.f32 %v203_v53, %v176_v51  ;;  %v207_v59 = vadd.f32 %v190_v52, %v175_v58 }
 0x296   :  { %729 = vtanh.f32 %v208_v54  ;;  %v209_v60 = vmul.f32 0.5, %v207_v59  ;;  %v210_v8 = vmul.f32 0.5, %v208_v54 }
 0x298   :  { %731 = vtanh.f32 %v209_v60 }
 0x29b   :  { %v192_v55 = vpop.f32.mrf.mxu2  ;;  %v205_v56 = vpop.f32.mrf.mxu3 }
 0x29c   :  { %v730_v57 = vpop.eup %729 }
 0x29d   :  { %220 = vrot.lane.b32.xlu1 %v730_v57, %s895_s0 }
 0x29e   :  { %v732_v61 = vpop.eup %731 }
 0x29f   :  { %v213_v62 = vmul.f32 0.5, %v732_v61 }
 0x2a1   :  { %v215_v63 = vadd.f32 0.5, %v213_v62 }
 0x2a3   :  { %v218_v2 = vmul.f32 %v215_v63, %v167_v42 }
 0x30f   :  { %v221_v0 = vpop.permute.xlu1 %220 }
 0x310   :  { %v223_v1 = vmul.f32 %v221_v0, %v215_v63 }
 0x312   :  { %225 = vrot.lane.b32.xlu2 %v223_v1, %s895_s0  ;;  %v359_v1 = vld [vmem:[#allocation2 + $0x48] sm:$0xff] }
 0x36c   :  { %v226_v4 = vpop.permute.xlu2 %225 }
 0x36d   :  { %v228_v5 = vadd.f32 %v226_v4, %v218_v2 }
 0x36f   :  { %733 = vtanh.f32 %v228_v5 }
 0x370   :  { %735 = vtanh.f32 %v210_v8 }
 0x375   :  { %v734_v7 = vpop.eup %733 }
 0x376   :  { %231 = vrot.lane.b32.xlu2 %v734_v7, %s895_s0  ;;  %v736_v9 = vpop.eup %735 }
 0x377   :  { %v214_v10 = vmul.f32 0.5, %v736_v9 }
 0x379   :  { %v216_v11 = vadd.f32 0.5, %v214_v10  ;;  %v358_v10 = vld [vmem:[#allocation2 + $0x40] sm:$0xff] }
 0x3d0   :  { %v232_v15 = vpop.permute.xlu2 %231 }
 0x3d1   :  { %v234_v16 = vmul.f32 %v232_v15, %v216_v11 }
 0x3d3   :  { %v238_v17 = vpack.c.bf16 %v234_v16, %v234_v16 }
 0x3d5   :  { %689 = vmatmul.msk.bf16.vlgmr.msrb.gmra.mxu0 %vm116_vm0, %v238_v17  ;;  %690 = vmatmul.msk.bf16.vlgmr.msrb.gmra.mxu1 %vm116_vm0, %v238_v17 }
 0x3d6   :  { %503 = vmatpush.bf16.msrb.mxu1 %v931_v3  ;;  %490 = vmatpush.bf16.msrb.mxu0 %v937_v12 }
 0x3da   :  { %504 = vmatpush.bf16.msrb.mxu1 %v934_v6  ;;  %491 = vmatpush.bf16.msrb.mxu0 %v940_v13 }
 0x3de   :  { %505 = vmatpush.bf16.msrb.mxu1 %v944_v14  ;;  %492 = vmatpush.bf16.msrb.mxu0 %v948_v19 }
 0x3e2   :  { %506 = vmatpush.bf16.msrb.mxu1 %v952_v20  ;;  %493 = vmatpush.bf16.msrb.mxu0 %v956_v23 }
 0x452   :  { %v251_v21 = vpop.f32.mrf.mxu0  ;;  %v264_v22 = vpop.f32.mrf.mxu1 }
 0x453   :  { %v269_v24 = vadd.f32 %v264_v22, %v237_v18  ;;  %v268_v29 = vadd.f32 %v251_v21, %v236_v28 }
 0x455   :  { %737 = vtanh.f32 %v269_v24  ;;  %v270_v30 = vmul.f32 0.5, %v268_v29  ;;  %v271_v40 = vmul.f32 0.5, %v269_v24 }
 0x457   :  { %739 = vtanh.f32 %v270_v30 }
 0x45a   :  { %v253_v25 = vpop.f32.mrf.mxu0  ;;  %v266_v26 = vpop.f32.mrf.mxu1 }
 0x45b   :  { %v738_v27 = vpop.eup %737 }
 0x45c   :  { %281 = vrot.lane.b32.xlu0 %v738_v27, %s895_s0 }
 0x45d   :  { %v740_v31 = vpop.eup %739 }
 0x45e   :  { %v274_v32 = vmul.f32 0.5, %v740_v31 }
 0x460   :  { %v276_v33 = vadd.f32 0.5, %v274_v32 }
 0x462   :  { %v279_v36 = vmul.f32 %v276_v33, %v228_v5 }
 0x4ce   :  { %v282_v34 = vpop.permute.xlu0 %281 }
 0x4cf   :  { %v284_v35 = vmul.f32 %v282_v34, %v276_v33 }
 0x4d1   :  { %286 = vrot.lane.b32.xlu1 %v284_v35, %s895_s0  ;;  %v420_v35 = vld [vmem:[#allocation2 + $0x58] sm:$0xff] }
 0x543   :  { %v287_v37 = vpop.permute.xlu1 %286 }
 0x544   :  { %v289_v38 = vadd.f32 %v287_v37, %v279_v36 }
 0x546   :  { %741 = vtanh.f32 %v289_v38 }
 0x547   :  { %743 = vtanh.f32 %v271_v40 }
 0x54c   :  { %v742_v39 = vpop.eup %741 }
 0x54d   :  { %292 = vrot.lane.b32.xlu2 %v742_v39, %s895_s0  ;;  %v744_v41 = vpop.eup %743 }
 0x54e   :  { %v275_v42 = vmul.f32 0.5, %v744_v41 }
 0x550   :  { %v277_v43 = vadd.f32 0.5, %v275_v42  ;;  %v419_v42 = vld [vmem:[#allocation2 + $0x50] sm:$0xff] }
 0x5a7   :  { %v293_v44 = vpop.permute.xlu2 %292 }
 0x5a8   :  { %v295_v45 = vmul.f32 %v293_v44, %v277_v43 }
 0x5aa   :  { %v299_v46 = vpack.c.bf16 %v295_v45, %v295_v45 }
 0x5ac   :  { %691 = vmatmul.msk.bf16.vlgmr.msrb.gmra.mxu2 %vm116_vm0, %v299_v46  ;;  %692 = vmatmul.msk.bf16.vlgmr.msrb.gmra.mxu3 %vm116_vm0, %v299_v46 }
 0x5ad   :  { %564 = vmatpush.bf16.msrb.mxu3 %v931_v3  ;;  %551 = vmatpush.bf16.msrb.mxu2 %v937_v12 }
 0x5b1   :  { %565 = vmatpush.bf16.msrb.mxu3 %v934_v6  ;;  %552 = vmatpush.bf16.msrb.mxu2 %v940_v13  ;;  %v297_v6 = vld [vmem:[#allocation2 + $0x30] sm:$0xff] }
 0x5b5   :  { %566 = vmatpush.bf16.msrb.mxu3 %v944_v14  ;;  %553 = vmatpush.bf16.msrb.mxu2 %v948_v19 }
 0x5b9   :  { %567 = vmatpush.bf16.msrb.mxu3 %v952_v20  ;;  %554 = vmatpush.bf16.msrb.mxu2 %v956_v23 }
 0x62f   :  { %v312_v48 = vpop.f32.mrf.mxu2  ;;  %v325_v49 = vpop.f32.mrf.mxu3 }
 0x630   :  { %v330_v50 = vadd.f32 %v325_v49, %v298_v47  ;;  %v329_v13 = vadd.f32 %v312_v48, %v297_v6 }
 0x632   :  { %745 = vtanh.f32 %v330_v50  ;;  %v331_v52 = vmul.f32 0.5, %v329_v13  ;;  %v332_v58 = vmul.f32 0.5, %v330_v50 }
 0x634   :  { %747 = vtanh.f32 %v331_v52 }
 0x637   :  { %v314_v3 = vpop.f32.mrf.mxu2  ;;  %v327_v51 = vpop.f32.mrf.mxu3 }
 0x638   :  { %v746_v12 = vpop.eup %745 }
 0x639   :  { %342 = vrot.lane.b32.xlu0 %v746_v12, %s895_s0 }
 0x63a   :  { %v748_v14 = vpop.eup %747 }
 0x63b   :  { %v335_v19 = vmul.f32 0.5, %v748_v14 }
 0x63d   :  { %v337_v53 = vadd.f32 0.5, %v335_v19 }
 0x63f   :  { %v340_v23 = vmul.f32 %v337_v53, %v289_v38 }
 0x6ab   :  { %v343_v20 = vpop.permute.xlu0 %342 }
 0x6ac   :  { %v345_v54 = vmul.f32 %v343_v20, %v337_v53 }
 0x6ae   :  { %347 = vrot.lane.b32.xlu1 %v345_v54, %s895_s0  ;;  %v481_v54 = vld [vmem:[#allocation2 + $0x68] sm:$0xff] }
 0x720   :  { %v348_v55 = vpop.permute.xlu1 %347 }
 0x721   :  { %v350_v56 = vadd.f32 %v348_v55, %v340_v23 }
 0x723   :  { %749 = vtanh.f32 %v350_v56 }
 0x724   :  { %751 = vtanh.f32 %v332_v58 }
 0x729   :  { %v750_v57 = vpop.eup %749 }
 0x72a   :  { %353 = vrot.lane.b32.xlu2 %v750_v57, %s895_s0  ;;  %v752_v59 = vpop.eup %751 }
 0x72b   :  { %v336_v60 = vmul.f32 0.5, %v752_v59 }
 0x72d   :  { %v338_v61 = vadd.f32 0.5, %v336_v60  ;;  %v480_v60 = vld [vmem:[#allocation2 + $0x60] sm:$0xff] }
 0x784   :  { %v354_v62 = vpop.permute.xlu2 %353 }
 0x785   :  { %v356_v63 = vmul.f32 %v354_v62, %v338_v61 }
 0x787   :  { %v360_v0 = vpack.c.bf16 %v356_v63, %v356_v63 }
 0x789   :  { %693 = vmatmul.msk.bf16.vlgmr.msra.gmra.mxu0 %vm116_vm0, %v360_v0  ;;  %694 = vmatmul.msk.bf16.vlgmr.msra.gmra.mxu1 %vm116_vm0, %v360_v0 }
 0x806   :  { %v373_v2 = vpop.f32.mrf.mxu0  ;;  %v386_v4 = vpop.f32.mrf.mxu1 }
 0x807   :  { %v391_v5 = vadd.f32 %v386_v4, %v359_v1  ;;  %v390_v11 = vadd.f32 %v373_v2, %v358_v10 }
 0x809   :  { %753 = vtanh.f32 %v391_v5  ;;  %v392_v15 = vmul.f32 0.5, %v390_v11  ;;  %v393_v28 = vmul.f32 0.5, %v391_v5 }
 0x80b   :  { %755 = vtanh.f32 %v392_v15 }
 0x80e   :  { %v375_v7 = vpop.f32.mrf.mxu0  ;;  %v388_v8 = vpop.f32.mrf.mxu1 }
 0x80f   :  { %v754_v9 = vpop.eup %753 }
 0x810   :  { %403 = vrot.lane.b32.xlu0 %v754_v9, %s895_s0 }
 0x811   :  { %v756_v16 = vpop.eup %755 }
 0x812   :  { %v396_v17 = vmul.f32 0.5, %v756_v16 }
 0x814   :  { %v398_v18 = vadd.f32 0.5, %v396_v17 }
 0x816   :  { %v401_v24 = vmul.f32 %v398_v18, %v350_v56 }
 0x882   :  { %v404_v21 = vpop.permute.xlu0 %403 }
 0x883   :  { %v406_v22 = vmul.f32 %v404_v21, %v398_v18 }
 0x885   :  { %408 = vrot.lane.b32.xlu1 %v406_v22, %s895_s0  ;;  %v542_v22 = vld [vmem:[#allocation2 + $0x78] sm:$0xff] }
 0x8f7   :  { %v409_v25 = vpop.permute.xlu1 %408 }
 0x8f8   :  { %v411_v26 = vadd.f32 %v409_v25, %v401_v24 }
 0x8fa   :  { %757 = vtanh.f32 %v411_v26 }
 0x8fb   :  { %759 = vtanh.f32 %v393_v28 }
 0x900   :  { %v758_v27 = vpop.eup %757 }
 0x901   :  { %414 = vrot.lane.b32.xlu2 %v758_v27, %s895_s0  ;;  %v760_v29 = vpop.eup %759 }
 0x902   :  { %v397_v30 = vmul.f32 0.5, %v760_v29 }
 0x904   :  { %v399_v31 = vadd.f32 0.5, %v397_v30  ;;  %v541_v30 = vld [vmem:[#allocation2 + $0x70] sm:$0xff] }
 0x95b   :  { %v415_v32 = vpop.permute.xlu2 %414 }
 0x95c   :  { %v417_v33 = vmul.f32 %v415_v32, %v399_v31 }
 0x95e   :  { %v421_v34 = vpack.c.bf16 %v417_v33, %v417_v33 }
 0x960   :  { %695 = vmatmul.msk.bf16.vlgmr.msra.gmra.mxu2 %vm116_vm0, %v421_v34  ;;  %696 = vmatmul.msk.bf16.vlgmr.msra.gmra.mxu3 %vm116_vm0, %v421_v34 }
 0x9e3   :  { %v434_v36 = vpop.f32.mrf.mxu2  ;;  %v447_v37 = vpop.f32.mrf.mxu3 }
 0x9e4   :  { %v452_v38 = vadd.f32 %v447_v37, %v420_v35  ;;  %v451_v43 = vadd.f32 %v434_v36, %v419_v42  ;;  %v604_v42 = vld [vmem:[#allocation7 + $0x18] sm:$0xff] }
 0x9e6   :  { %761 = vtanh.f32 %v452_v38  ;;  %v453_v44 = vmul.f32 0.5, %v451_v43  ;;  %v454_v6 = vmul.f32 0.5, %v452_v38  ;;  %v608_v38 = vld [vmem:[#allocation7 + $0x38] sm:$0xff]  ;;  %v603_v43 = vld [vmem:[#allocation7 + $0x10] sm:$0xff] }
 0x9e7   :  { %624 = vmatpush.msra.mxu0 %v608_v38 }
 0x9e8   :  { %763 = vtanh.f32 %v453_v44  ;;  %v602_v44 = vld [vmem:[#allocation7 + $0x8] sm:$0xff] }
 0x9eb   :  { %v436_v39 = vpop.f32.mrf.mxu2  ;;  %v449_v40 = vpop.f32.mrf.mxu3 }
 0x9ec   :  { %v762_v41 = vpop.eup %761  ;;  %v607_v39 = vld [vmem:[#allocation7 + $0x30] sm:$0xff]  ;;  %v606_v40 = vld [vmem:[#allocation7 + $0x28] sm:$0xff] }
 0x9ed   :  { %464 = vrot.lane.b32.xlu0 %v762_v41, %s895_s0  ;;  %625 = vmatpush.msra.mxu0 %v607_v39  ;;  %v605_v41 = vld [vmem:[#allocation7 + $0x20] sm:$0xff] }
 0x9ee   :  { %v764_v45 = vpop.eup %763 }
 0x9ef   :  { %v457_v46 = vmul.f32 0.5, %v764_v45  ;;  %626 = vmatpush.msra.mxu0 %v606_v40 }
 0x9f1   :  { %v459_v47 = vadd.f32 0.5, %v457_v46  ;;  %627 = vmatpush.msra.mxu0 %v605_v41 }
 0x9f3   :  { %v462_v50 = vmul.f32 %v459_v47, %v411_v26  ;;  %628 = vmatpush.msra.mxu0 %v604_v42 }
 0x9f5   :  { %629 = vmatpush.msra.mxu0 %v603_v43 }
 0x9f7   :  { %630 = vmatpush.msra.mxu0 %v602_v44 }
 0xa5f   :  { %v465_v48 = vpop.permute.xlu0 %464 }
 0xa60   :  { %v467_v49 = vmul.f32 %v465_v48, %v459_v47 }
 0xa62   :  { %469 = vrot.lane.b32.xlu1 %v467_v49, %s895_s0  ;;  %v601_v49 = vld [vmem:[#allocation7] sm:$0xff] }
 0xa63   :  { %631 = vmatpush.msra.mxu0 %v601_v49 }
 0xad4   :  { %v470_v3 = vpop.permute.xlu1 %469 }
 0xad5   :  { %v472_v51 = vadd.f32 %v470_v3, %v462_v50 }
 0xad7   :  { %765 = vtanh.f32 %v472_v51 }
 0xad8   :  { %767 = vtanh.f32 %v454_v6 }
 0xadd   :  { %v766_v12 = vpop.eup %765 }
 0xade   :  { %475 = vrot.lane.b32.xlu2 %v766_v12, %s895_s0  ;;  %v768_v13 = vpop.eup %767 }
 0xadf   :  { %v458_v52 = vmul.f32 0.5, %v768_v13 }
 0xae1   :  { %v460_v14 = vadd.f32 0.5, %v458_v52  ;;  %v720_v52 = vld [vmem:[%s1059_s3] ss:$0 sm:$0xff] }
 0xb38   :  { %v476_v19 = vpop.permute.xlu2 %475 }
 0xb39   :  { %v478_v53 = vmul.f32 %v476_v19, %v460_v14 }
 0xb3b   :  { %v482_v20 = vpack.c.bf16 %v478_v53, %v478_v53 }
 0xb3d   :  { %697 = vmatmul.msk.bf16.vlgmr.msrb.gmra.mxu0 %vm116_vm0, %v482_v20  ;;  %698 = vmatmul.msk.bf16.vlgmr.msrb.gmra.mxu1 %vm116_vm0, %v482_v20 }
 0xbba   :  { %v495_v23 = vpop.f32.mrf.mxu0  ;;  %v508_v55 = vpop.f32.mrf.mxu1 }
 0xbbb   :  { %v513_v56 = vadd.f32 %v508_v55, %v481_v54  ;;  %v512_v61 = vadd.f32 %v495_v23, %v480_v60 }
 0xbbd   :  { %769 = vtanh.f32 %v513_v56  ;;  %v514_v62 = vmul.f32 0.5, %v512_v61  ;;  %v515_v10 = vmul.f32 0.5, %v513_v56 }
 0xbbf   :  { %771 = vtanh.f32 %v514_v62 }
 0xbc2   :  { %v497_v57 = vpop.f32.mrf.mxu0  ;;  %v510_v58 = vpop.f32.mrf.mxu1 }
 0xbc3   :  { %v770_v59 = vpop.eup %769 }
 0xbc4   :  { %525 = vrot.lane.b32.xlu0 %v770_v59, %s895_s0 }
 0xbc5   :  { %v772_v63 = vpop.eup %771 }
 0xbc6   :  { %v518_v0 = vmul.f32 0.5, %v772_v63 }
 0xbc8   :  { %v520_v1 = vadd.f32 0.5, %v518_v0 }
 0xbca   :  { %v523_v5 = vmul.f32 %v520_v1, %v472_v51 }
 0xc36   :  { %v526_v2 = vpop.permute.xlu0 %525 }
 0xc37   :  { %v528_v4 = vmul.f32 %v526_v2, %v520_v1 }
 0xc39   :  { %530 = vrot.lane.b32.xlu1 %v528_v4, %s895_s0 }
 0xcab   :  { %v531_v7 = vpop.permute.xlu1 %530 }
 0xcac   :  { %v533_v8 = vadd.f32 %v531_v7, %v523_v5 }
 0xcae   :  { %773 = vtanh.f32 %v533_v8 }
 0xcaf   :  { %775 = vtanh.f32 %v515_v10 }
 0xcb4   :  { %v774_v9 = vpop.eup %773 }
 0xcb5   :  { %536 = vrot.lane.b32.xlu2 %v774_v9, %s895_s0  ;;  %v776_v11 = vpop.eup %775 }
 0xcb6   :  { %v519_v15 = vmul.f32 0.5, %v776_v11 }
 0xcb8   :  { %v521_v16 = vadd.f32 0.5, %v519_v15 }
 0xd0f   :  { %v537_v17 = vpop.permute.xlu2 %536 }
 0xd10   :  { %v539_v18 = vmul.f32 %v537_v17, %v521_v16 }
 0xd12   :  { %v543_v21 = vpack.c.bf16 %v539_v18, %v539_v18 }
 0xd14   :  { %699 = vmatmul.msk.bf16.vlgmr.msrb.gmra.mxu2 %vm116_vm0, %v543_v21  ;;  %700 = vmatmul.msk.bf16.vlgmr.msrb.gmra.mxu3 %vm116_vm0, %v543_v21 }
 0xd97   :  { %v556_v24 = vpop.f32.mrf.mxu2  ;;  %v569_v25 = vpop.f32.mrf.mxu3 }
 0xd98   :  { %v574_v26 = vadd.f32 %v569_v25, %v542_v22  ;;  %v573_v31 = vadd.f32 %v556_v24, %v541_v30 }
 0xd9a   :  { %777 = vtanh.f32 %v574_v26  ;;  %v575_v32 = vmul.f32 0.5, %v573_v31  ;;  %v576_v50 = vmul.f32 0.5, %v574_v26 }
 0xd9c   :  { %779 = vtanh.f32 %v575_v32 }
 0xd9f   :  { %v558_v27 = vpop.f32.mrf.mxu2  ;;  %v571_v28 = vpop.f32.mrf.mxu3 }
 0xda0   :  { %v778_v29 = vpop.eup %777 }
 0xda1   :  { %586 = vrot.lane.b32.xlu0 %v778_v29, %s895_s0 }
 0xda2   :  { %v780_v33 = vpop.eup %779 }
 0xda3   :  { %v579_v34 = vmul.f32 0.5, %v780_v33 }
 0xda5   :  { %v581_v35 = vadd.f32 0.5, %v579_v34 }
 0xda7   :  { %v584_v45 = vmul.f32 %v581_v35, %v533_v8 }
 0xe13   :  { %v587_v36 = vpop.permute.xlu0 %586 }
 0xe14   :  { %v589_v37 = vmul.f32 %v587_v36, %v581_v35 }
 0xe16   :  { %591 = vrot.lane.b32.xlu1 %v589_v37, %s895_s0 }
 0xe88   :  { %v592_v46 = vpop.permute.xlu1 %591 }
 0xe89   :  { %v594_v47 = vadd.f32 %v592_v46, %v584_v45 }
 0xe8b   :  { %781 = vtanh.f32 %v594_v47 }
 0xe8c   :  { %783 = vtanh.f32 %v576_v50 }
 0xe91   :  { %v782_v48 = vpop.eup %781 }
 0xe92   :  { %597 = vrot.lane.b32.xlu2 %v782_v48, %s895_s0  ;;  %v784_v3 = vpop.eup %783 }
 0xe93   :  { %v580_v51 = vmul.f32 0.5, %v784_v3 }
 0xe95   :  { %v582_v12 = vadd.f32 0.5, %v580_v51 }
 0xeec   :  { %v598_v6 = vpop.permute.xlu2 %597 }
 0xeed   :  { %v600_v13 = vmul.f32 %v598_v6, %v582_v12 }
 0xeef   :  { %701 = vmatmul.msk.f32.vlgmr.msra.gmra.mxu0 %vm116_vm0, %v600_v13 }
 0xf6c   :  { %v633_v14 = vpop.f32.mrf.mxu0 }
 0xf6d   :  { %v634_v19 = vadd.f32 %v720_v52, %v633_v14 }
 0xf6f   :  { %636 = vst [vmem:[#allocation8] sm:$0xff] %v634_v19 }
 0xf70   :  { %647 = dma.vmem_to_hbm [thread:$0]  %s643_s9, 128, %s645_s12, [#allocation4]  }
 0xf71   :  { %885 = dma.done.wait [#allocation4], 128  }
 0xf72   :  { %886 = vsyncadd [#allocation4], 4294967168 }
 0xf73   :  { %652 = vsyncpa [#allocation3], 1 }
 0xf74   :  { %653 = vsyncpa [#allocation6], 1 }
 0xf75   :  { %654 = vsyncpa [#allocation4], 1 }

</bundles_post_ra>
